<compile_context>
chip_gen: v5e
topology: v5e:2x2
jax: 0.10.0
libtpu: 0.0.40
codegen_flags: <defaults>
</compile_context>

<pallas_src>
import math
import functools

import jax
import jax.numpy as jnp
from jax import lax
from jax.experimental import pallas as pl
from jax.experimental.pallas import tpu as pltpu


# ---------------------------------------------------------------------------
# Fused kernel: one grid step == one batch element (all heads).
# ---------------------------------------------------------------------------
def _mha_fused_kernel(x_ref, wqkv_ref, wo_ref, o_ref, *, num_heads, num_rep, d_head):
    xb = x_ref[0]                                   # (S, D)
    inv_scale = 1.0 / math.sqrt(d_head)             # compile-time constant

    # Fused QKV projection: one MXU matmul, f32 accumulation.
    qkv = jnp.dot(xb, wqkv_ref[...], preferred_element_type=jnp.float32)  # (S, (Hq+2Hkv)*dh)

    hq_d = num_heads * d_head
    hkv_d = (num_heads // num_rep) * d_head
    q_all = qkv[:, :hq_d] * inv_scale               # scale folded into q (S*Hq*dh elems)
    k_all = qkv[:, hq_d:hq_d + hkv_d]               # (S, Hkv*dh)
    v_all = qkv[:, hq_d + hkv_d:]                   # (S, Hkv*dh)

    # Per query head: scores / softmax / context.  Static unrolled loop (Hq is small);
    # K/V for a group are sliced from VMEM, never re-fetched from HBM.
    ctx_parts = []
    for h in range(num_heads):
        g = h // num_rep                            # GQA: kv head serving query head h
        q_h = q_all[:, h * d_head:(h + 1) * d_head]     # (S, dh)
        k_h = k_all[:, g * d_head:(g + 1) * d_head]     # (S, dh)
        v_h = v_all[:, g * d_head:(g + 1) * d_head]     # (S, dh)

        # q_h @ k_h^T without materializing a transpose: contract on d_head.
        s = lax.dot_general(
            q_h, k_h, (((1,), (1,)), ((), ())),
            preferred_element_type=jnp.float32,
        )                                           # (S, S)

        m = jnp.max(s, axis=-1, keepdims=True)
        e = jnp.exp(s - m)
        l = jnp.sum(e, axis=-1, keepdims=True)
        p = e * pl.reciprocal(l, approx=True)       # EUP reciprocal + VPU multiply

        ctx_parts.append(
            jnp.dot(p, v_h, preferred_element_type=jnp.float32)  # (S, dh)
        )

    # Lane-dense (S, Hq*dh) context slab; output projection fused in-kernel.
    ctx = jnp.concatenate(ctx_parts, axis=-1)       # (S, Hq*dh)
    o_ref[0] = jnp.dot(ctx, wo_ref[...], preferred_element_type=jnp.float32).astype(o_ref.dtype)


# ---------------------------------------------------------------------------
# Wrapper: single pallas_call over grid=(B,)
# ---------------------------------------------------------------------------
def multi_head_attention(x, Wq, Wk, Wv, Wo, num_heads, num_kv_heads):
    B, S, D = x.shape
    d_head = Wq.shape[1] // num_heads
    num_rep = num_heads // num_kv_heads

    # One-time weight prep (would be done at module init in a real model).
    Wqkv = jnp.concatenate([Wq, Wk, Wv], axis=1)    # (D, (Hq + 2*Hkv)*dh)
    qkv_n = Wqkv.shape[1]
    hq_d = num_heads * d_head

    kernel = functools.partial(
        _mha_fused_kernel, num_heads=num_heads, num_rep=num_rep, d_head=d_head
    )

    return pl.pallas_call(
        kernel,
        out_shape=jax.ShapeDtypeStruct((B, S, D), x.dtype),
        grid=(B,),
        in_specs=[
            pl.BlockSpec((1, S, D), lambda b: (b, 0, 0)),       # x: one batch per step
            pl.BlockSpec((D, qkv_n), lambda b: (0, 0)),         # fused QKV weight (resident)
            pl.BlockSpec((hq_d, D), lambda b: (0, 0)),          # output weight (resident)
        ],
        out_specs=pl.BlockSpec((1, S, D), lambda b: (b, 0, 0)),
        compiler_params=pltpu.CompilerParams(
            dimension_semantics=("parallel",)                   # shards across v7x's 2 TCs
        ),
    )(x, Wqkv, Wo)


# ---------------------------------------------------------------------------
# Pure-JAX reference for verification
# ---------------------------------------------------------------------------
def reference(x, Wq, Wk, Wv, Wo, num_heads, num_kv_heads):
    B, S, D = x.shape
    dh = Wq.shape[1] // num_heads
    rep = num_heads // num_kv_heads
    q = (x @ Wq).reshape(B, S, num_heads, dh)
    k = (x @ Wk).reshape(B, S, num_kv_heads, dh)
    v = (x @ Wv).reshape(B, S, num_kv_heads, dh)
    k = jnp.repeat(k, rep, axis=2)
    v = jnp.repeat(v, rep, axis=2)
    q, k, v = (t.transpose(0, 2, 1, 3) for t in (q, k, v))
    s = jnp.einsum("bhqd,bhkd->bhqk", q, k) / math.sqrt(dh)
    p = jax.nn.softmax(s.astype(jnp.float32), axis=-1)
    c = jnp.einsum("bhqk,bhkd->bhqd", p, v)
    c = c.transpose(0, 2, 1, 3).reshape(B, S, num_heads * dh)
    return c @ Wo


if __name__ == "__main__":
    # Config (TransformerDecoderConfig analogue): small, deterministic.
    batch_size = 2
    seq_len = 8          # == context_length
    d_model = 32
    num_heads = 4
    num_kv_heads = 2
    d_head = d_model // num_heads  # 8

    key = jax.random.PRNGKey(0)
    kx, kq, kk, kv, ko = jax.random.split(key, 5)
    x = jax.random.normal(kx, (batch_size, seq_len, d_model), jnp.float32)
    # Weights stored as (in_features, out_features) so y = x @ W  (== torch Linear, no bias).
    Wq = 0.05 * jax.random.normal(kq, (d_model, num_heads * d_head), jnp.float32)
    Wk = 0.05 * jax.random.normal(kk, (d_model, num_kv_heads * d_head), jnp.float32)
    Wv = 0.05 * jax.random.normal(kv, (d_model, num_kv_heads * d_head), jnp.float32)
    Wo = 0.05 * jax.random.normal(ko, (num_heads * d_head, d_model), jnp.float32)

    out = multi_head_attention(x, Wq, Wk, Wv, Wo, num_heads, num_kv_heads)
    out = jax.block_until_ready(out)

    ref = reference(x, Wq, Wk, Wv, Wo, num_heads, num_kv_heads)
    assert out.shape == (batch_size, seq_len, d_model)
    # Tolerance allows for the EUP approximate reciprocal in the softmax normalization
    # (pl.reciprocal(..., approx=True)); use approx=False for bit-tighter accuracy.
    assert jnp.allclose(out, ref, atol=2e-3, rtol=2e-3), "mismatch vs JAX reference"
    print("KERNEL_OK")
</pallas_src>

<mosaic_0001>
module attributes {stable_mosaic.version = 11 : i64} {
  func.func @_mha_fused_kernel(%arg0: i32, %arg1: memref<1x8x32xf32, #tpu.memory_space<vmem>>, %arg2: memref<32x64xf32, #tpu.memory_space<vmem>>, %arg3: memref<32x32xf32, #tpu.memory_space<vmem>>, %arg4: memref<1x8x32xf32, #tpu.memory_space<vmem>>) attributes {dimension_semantics = [#tpu.dimension_semantics<parallel>], iteration_bounds = array<i64: 2>, scalar_prefetch = 0 : i64, scratch_operands = 0 : i64, tpu.core_type = #tpu.core_type<tc>, window_params = [{transform_indices = @transform_0, window_bounds = array<i64: 1, 8, 32>}, {pipeline_mode = #tpu.pipeline_mode<synchronous>, transform_indices = @transform_1, window_bounds = array<i64: 32, 64>}, {pipeline_mode = #tpu.pipeline_mode<synchronous>, transform_indices = @transform_2, window_bounds = array<i64: 32, 32>}, {transform_indices = @transform_3, window_bounds = array<i64: 1, 8, 32>}]} {
    %c0 = arith.constant 0 : index
    %c0_0 = arith.constant 0 : index
    %c0_1 = arith.constant 0 : index
    %0 = vector.load %arg1[%c0, %c0_0, %c0_1] : memref<1x8x32xf32, #tpu.memory_space<vmem>>, vector<1x8x32xf32>
    %1 = vector.shape_cast %0 : vector<1x8x32xf32> to vector<8x32xf32>
    %c0_2 = arith.constant 0 : index
    %c0_3 = arith.constant 0 : index
    %2 = vector.load %arg2[%c0_2, %c0_3] : memref<32x64xf32, #tpu.memory_space<vmem>>, vector<32x64xf32>
    %cst = arith.constant dense<0.000000e+00> : vector<8x64xf32>
    %3 = tpu.matmul %1, %2, %cst {dimension_numbers = #tpu.dot_dimension_numbers<[1], [0], [0], [1], [0, 0, 1, 1], [], []>} : vector<8x32xf32>, vector<32x64xf32>, vector<8x64xf32> -> vector<8x64xf32>
    %4 = vector.extract_strided_slice %3 {offsets = [0, 0], sizes = [8, 32], strides = [1, 1]} : vector<8x64xf32> to vector<8x32xf32>
    %cst_4 = arith.constant 0.353553385 : f32
    %5 = vector.broadcast %cst_4 : f32 to vector<8x32xf32>
    %6 = arith.mulf %4, %5 : vector<8x32xf32>
    %7 = vector.extract_strided_slice %3 {offsets = [0, 32], sizes = [8, 16], strides = [1, 1]} : vector<8x64xf32> to vector<8x16xf32>
    %8 = vector.extract_strided_slice %3 {offsets = [0, 48], sizes = [8, 16], strides = [1, 1]} : vector<8x64xf32> to vector<8x16xf32>
    %9 = vector.extract_strided_slice %6 {offsets = [0, 0], sizes = [8, 8], strides = [1, 1]} : vector<8x32xf32> to vector<8x8xf32>
    %10 = vector.extract_strided_slice %7 {offsets = [0, 0], sizes = [8, 8], strides = [1, 1]} : vector<8x16xf32> to vector<8x8xf32>
    %11 = vector.extract_strided_slice %8 {offsets = [0, 0], sizes = [8, 8], strides = [1, 1]} : vector<8x16xf32> to vector<8x8xf32>
    %cst_5 = arith.constant dense<0.000000e+00> : vector<8x8xf32>
    %12 = tpu.matmul %9, %10, %cst_5 {dimension_numbers = #tpu.dot_dimension_numbers<[1], [1], [0], [0], [0, 0, 1, 0], [], []>} : vector<8x8xf32>, vector<8x8xf32>, vector<8x8xf32> -> vector<8x8xf32>
    %cst_6 = arith.constant dense<0xFF800000> : vector<8xf32>
    %13 = vector.multi_reduction <maximumf>, %12, %cst_6 [1] : vector<8x8xf32> to vector<8xf32>
    %14 = vector.shape_cast %13 : vector<8xf32> to vector<8x1xf32>
    %15 = vector.broadcast %14 : vector<8x1xf32> to vector<8x8xf32>
    %16 = arith.subf %12, %15 : vector<8x8xf32>
    %17 = math.exp %16 : vector<8x8xf32>
    %cst_7 = arith.constant dense<0.000000e+00> : vector<8xf32>
    %18 = vector.multi_reduction <add>, %17, %cst_7 [1] : vector<8x8xf32> to vector<8xf32>
    %19 = vector.shape_cast %18 : vector<8xf32> to vector<8x1xf32>
    %20 = tpu.reciprocal %19 {approx = true} : vector<8x1xf32> -> vector<8x1xf32>
    %21 = vector.broadcast %20 : vector<8x1xf32> to vector<8x8xf32>
    %22 = arith.mulf %17, %21 : vector<8x8xf32>
    %cst_8 = arith.constant dense<0.000000e+00> : vector<8x8xf32>
    %23 = tpu.matmul %22, %11, %cst_8 {dimension_numbers = #tpu.dot_dimension_numbers<[1], [0], [0], [1], [0, 0, 1, 1], [], []>} : vector<8x8xf32>, vector<8x8xf32>, vector<8x8xf32> -> vector<8x8xf32>
    %24 = vector.extract_strided_slice %6 {offsets = [0, 8], sizes = [8, 8], strides = [1, 1]} : vector<8x32xf32> to vector<8x8xf32>
    %25 = vector.extract_strided_slice %7 {offsets = [0, 0], sizes = [8, 8], strides = [1, 1]} : vector<8x16xf32> to vector<8x8xf32>
    %26 = vector.extract_strided_slice %8 {offsets = [0, 0], sizes = [8, 8], strides = [1, 1]} : vector<8x16xf32> to vector<8x8xf32>
    %cst_9 = arith.constant dense<0.000000e+00> : vector<8x8xf32>
    %27 = tpu.matmul %24, %25, %cst_9 {dimension_numbers = #tpu.dot_dimension_numbers<[1], [1], [0], [0], [0, 0, 1, 0], [], []>} : vector<8x8xf32>, vector<8x8xf32>, vector<8x8xf32> -> vector<8x8xf32>
    %cst_10 = arith.constant dense<0xFF800000> : vector<8xf32>
    %28 = vector.multi_reduction <maximumf>, %27, %cst_10 [1] : vector<8x8xf32> to vector<8xf32>
    %29 = vector.shape_cast %28 : vector<8xf32> to vector<8x1xf32>
    %30 = vector.broadcast %29 : vector<8x1xf32> to vector<8x8xf32>
    %31 = arith.subf %27, %30 : vector<8x8xf32>
    %32 = math.exp %31 : vector<8x8xf32>
    %cst_11 = arith.constant dense<0.000000e+00> : vector<8xf32>
    %33 = vector.multi_reduction <add>, %32, %cst_11 [1] : vector<8x8xf32> to vector<8xf32>
    %34 = vector.shape_cast %33 : vector<8xf32> to vector<8x1xf32>
    %35 = tpu.reciprocal %34 {approx = true} : vector<8x1xf32> -> vector<8x1xf32>
    %36 = vector.broadcast %35 : vector<8x1xf32> to vector<8x8xf32>
    %37 = arith.mulf %32, %36 : vector<8x8xf32>
    %cst_12 = arith.constant dense<0.000000e+00> : vector<8x8xf32>
    %38 = tpu.matmul %37, %26, %cst_12 {dimension_numbers = #tpu.dot_dimension_numbers<[1], [0], [0], [1], [0, 0, 1, 1], [], []>} : vector<8x8xf32>, vector<8x8xf32>, vector<8x8xf32> -> vector<8x8xf32>
    %39 = vector.extract_strided_slice %6 {offsets = [0, 16], sizes = [8, 8], strides = [1, 1]} : vector<8x32xf32> to vector<8x8xf32>
    %40 = vector.extract_strided_slice %7 {offsets = [0, 8], sizes = [8, 8], strides = [1, 1]} : vector<8x16xf32> to vector<8x8xf32>
    %41 = vector.extract_strided_slice %8 {offsets = [0, 8], sizes = [8, 8], strides = [1, 1]} : vector<8x16xf32> to vector<8x8xf32>
    %cst_13 = arith.constant dense<0.000000e+00> : vector<8x8xf32>
    %42 = tpu.matmul %39, %40, %cst_13 {dimension_numbers = #tpu.dot_dimension_numbers<[1], [1], [0], [0], [0, 0, 1, 0], [], []>} : vector<8x8xf32>, vector<8x8xf32>, vector<8x8xf32> -> vector<8x8xf32>
    %cst_14 = arith.constant dense<0xFF800000> : vector<8xf32>
    %43 = vector.multi_reduction <maximumf>, %42, %cst_14 [1] : vector<8x8xf32> to vector<8xf32>
    %44 = vector.shape_cast %43 : vector<8xf32> to vector<8x1xf32>
    %45 = vector.broadcast %44 : vector<8x1xf32> to vector<8x8xf32>
    %46 = arith.subf %42, %45 : vector<8x8xf32>
    %47 = math.exp %46 : vector<8x8xf32>
    %cst_15 = arith.constant dense<0.000000e+00> : vector<8xf32>
    %48 = vector.multi_reduction <add>, %47, %cst_15 [1] : vector<8x8xf32> to vector<8xf32>
    %49 = vector.shape_cast %48 : vector<8xf32> to vector<8x1xf32>
    %50 = tpu.reciprocal %49 {approx = true} : vector<8x1xf32> -> vector<8x1xf32>
    %51 = vector.broadcast %50 : vector<8x1xf32> to vector<8x8xf32>
    %52 = arith.mulf %47, %51 : vector<8x8xf32>
    %cst_16 = arith.constant dense<0.000000e+00> : vector<8x8xf32>
    %53 = tpu.matmul %52, %41, %cst_16 {dimension_numbers = #tpu.dot_dimension_numbers<[1], [0], [0], [1], [0, 0, 1, 1], [], []>} : vector<8x8xf32>, vector<8x8xf32>, vector<8x8xf32> -> vector<8x8xf32>
    %54 = vector.extract_strided_slice %6 {offsets = [0, 24], sizes = [8, 8], strides = [1, 1]} : vector<8x32xf32> to vector<8x8xf32>
    %55 = vector.extract_strided_slice %7 {offsets = [0, 8], sizes = [8, 8], strides = [1, 1]} : vector<8x16xf32> to vector<8x8xf32>
    %56 = vector.extract_strided_slice %8 {offsets = [0, 8], sizes = [8, 8], strides = [1, 1]} : vector<8x16xf32> to vector<8x8xf32>
    %cst_17 = arith.constant dense<0.000000e+00> : vector<8x8xf32>
    %57 = tpu.matmul %54, %55, %cst_17 {dimension_numbers = #tpu.dot_dimension_numbers<[1], [1], [0], [0], [0, 0, 1, 0], [], []>} : vector<8x8xf32>, vector<8x8xf32>, vector<8x8xf32> -> vector<8x8xf32>
    %cst_18 = arith.constant dense<0xFF800000> : vector<8xf32>
    %58 = vector.multi_reduction <maximumf>, %57, %cst_18 [1] : vector<8x8xf32> to vector<8xf32>
    %59 = vector.shape_cast %58 : vector<8xf32> to vector<8x1xf32>
    %60 = vector.broadcast %59 : vector<8x1xf32> to vector<8x8xf32>
    %61 = arith.subf %57, %60 : vector<8x8xf32>
    %62 = math.exp %61 : vector<8x8xf32>
    %cst_19 = arith.constant dense<0.000000e+00> : vector<8xf32>
    %63 = vector.multi_reduction <add>, %62, %cst_19 [1] : vector<8x8xf32> to vector<8xf32>
    %64 = vector.shape_cast %63 : vector<8xf32> to vector<8x1xf32>
    %65 = tpu.reciprocal %64 {approx = true} : vector<8x1xf32> -> vector<8x1xf32>
    %66 = vector.broadcast %65 : vector<8x1xf32> to vector<8x8xf32>
    %67 = arith.mulf %62, %66 : vector<8x8xf32>
    %cst_20 = arith.constant dense<0.000000e+00> : vector<8x8xf32>
    %68 = tpu.matmul %67, %56, %cst_20 {dimension_numbers = #tpu.dot_dimension_numbers<[1], [0], [0], [1], [0, 0, 1, 1], [], []>} : vector<8x8xf32>, vector<8x8xf32>, vector<8x8xf32> -> vector<8x8xf32>
    %69 = tpu.concatenate %23, %38, %53, %68 in 1 : vector<8x8xf32>, vector<8x8xf32>, vector<8x8xf32>, vector<8x8xf32> -> vector<8x32xf32>
    %c0_21 = arith.constant 0 : index
    %c0_22 = arith.constant 0 : index
    %70 = vector.load %arg3[%c0_21, %c0_22] : memref<32x32xf32, #tpu.memory_space<vmem>>, vector<32x32xf32>
    %cst_23 = arith.constant dense<0.000000e+00> : vector<8x32xf32>
    %71 = tpu.matmul %69, %70, %cst_23 {dimension_numbers = #tpu.dot_dimension_numbers<[1], [0], [0], [1], [0, 0, 1, 1], [], []>} : vector<8x32xf32>, vector<32x32xf32>, vector<8x32xf32> -> vector<8x32xf32>
    %c0_24 = arith.constant 0 : index
    %c0_25 = arith.constant 0 : index
    %c0_26 = arith.constant 0 : index
    %72 = vector.load %arg4[%c0_24, %c0_25, %c0_26] : memref<1x8x32xf32, #tpu.memory_space<vmem>>, vector<1x8x32xf32>
    %73 = vector.shape_cast %72 : vector<1x8x32xf32> to vector<8x32xf32>
    %74 = vector.shape_cast %71 : vector<8x32xf32> to vector<1x8x32xf32>
    tpu.vector_store %arg4[%c0_24, %c0_25, %c0_26], %74 {strides = array<i32>} : memref<1x8x32xf32, #tpu.memory_space<vmem>>, vector<1x8x32xf32>,
    return
  }
  func.func @transform_0(%arg0: i32) -> (i32, i32, i32) {
    %c0_i32 = arith.constant 0 : i32
    %c0_i32_0 = arith.constant 0 : i32
    %c0_i32_1 = arith.constant 0 : i32
    return %arg0, %c0_i32, %c0_i32_0 : i32, i32, i32
  }
  func.func @transform_1(%arg0: i32) -> (i32, i32) {
    %c0_i32 = arith.constant 0 : i32
    %c0_i32_0 = arith.constant 0 : i32
    %c0_i32_1 = arith.constant 0 : i32
    return %c0_i32, %c0_i32_0 : i32, i32
  }
  func.func @transform_2(%arg0: i32) -> (i32, i32) {
    %c0_i32 = arith.constant 0 : i32
    %c0_i32_0 = arith.constant 0 : i32
    %c0_i32_1 = arith.constant 0 : i32
    return %c0_i32, %c0_i32_0 : i32, i32
  }
  func.func @transform_3(%arg0: i32) -> (i32, i32, i32) {
    %c0_i32 = arith.constant 0 : i32
    %c0_i32_0 = arith.constant 0 : i32
    %c0_i32_1 = arith.constant 0 : i32
    return %arg0, %c0_i32, %c0_i32_0 : i32, i32, i32
  }
}

</mosaic_0001>

<bundles_post_ra>
// kernel: tpu_custom_call.1
= control target key start
LH: loop header
LB: loop body
LE: loop exit
PB: predicated region body
PF: predicated region fallthrough
CT: control target
= control target key end

     0   :  { %8 = vsyncpa [#allocation3], 0  ;;  %s1149_s0 = inlined_call_operand.hbm [shape: f32[2,8,32], index: 0, kind: input, shape index: {}]   ;;  %s1150_s1 = inlined_call_operand.hbm [shape: f32[32,64], index: 1, kind: input, shape index: {}]   ;;  %s1151_s2 = inlined_call_operand.hbm [shape: f32[32,32], index: 2, kind: input, shape index: {}]   ;;  %s1152_s3 = inlined_call_operand.hbm [shape: f32[2,8,32], index: 3, kind: output, shape index: {}]  }
   0x1   :  { %10 = vsyncpa [#allocation3 + $0x1], 0 }
   0x2   :  { %11 = vsyncpa [#allocation6], 0 }
   0x3   :  { %12 = vsyncpa [#allocation4], 0 }
   0x4   :  { %14 = vsyncpa [#allocation4 + $0x1], 0  ;;  %s969_s12 = smov 0   ;;  %s971_s13 = smov 0  }
   0x5   :  { %s973_s14 = smov 0   ;;  %s975_s15 = smov 0  }
   0x6 LB: > { %s130_s18 = sshll.u32 %s1150_s1, 4  ;;  %s993_s19 = sadd.s32 4294967295, %s933_s15   ;;  %s933_s15 = sphi %s975_s15, %s1163_s15   ;;  %s929_s14 = sphi %s973_s14, %s1162_s14   ;;  %s925_s13 = sphi %s971_s13, %s1161_s13   ;;  %s921_s12 = sphi %s969_s12, %s1160_s12   ;;  %s131_s18 = int_to_ptr.hbm [resolvable:$true] %s130_s18 }
   0x7   : > { %p649_p0 = scmp.ge.s32.totalorder %s933_s15, 1  ;;  %p41_p1 = scmp.eq.s32.totalorder %s993_s19, 0 }
   0x8   : > { %p119_p2 = scmp.lt.s32.totalorder %s933_s15, 3  ;;  %s935_s21 = smov [#allocation5]  }
   0x9   : > { %s132_s22 = sshll.u32 %s935_s21, 4  ;;  %s144_s25 = sshll.u32 %s1151_s2, 4  ;;  %s133_s22 = int_to_ptr.vmem [resolvable:$true] %s132_s22  ;;  %s145_s25 = int_to_ptr.hbm [resolvable:$true] %s144_s25 }
   0xa   : > { %p998_p3 = pnand %p649_p0, %p119_p2  ;;  %s936_s26 = smov [#allocation7]  }
   0xb   : > { %s146_s27 = sshll.u32 %s936_s26, 4  ;;  %s937_s28 = smov 128   ;;  %s147_s27 = int_to_ptr.vmem [resolvable:$true] %s146_s27 }
   0xc   : > { %p690_p4 = pneg %p998_p3  ;;  %s938_s29 = smov 8  }
   0xd   : > { %s648_s30 = sadd.s32 4294967294, %s933_s15   ;;  %s1012_s4 = sadd.s32 1, %s933_s15  }
   0xe   : > { %p691_p6 = pnand %p690_p4, %p41_p1  ;;  %s24_s5 = ssub.s32 %s933_s15, %s1012_s4 }
   0xf   : > { %s27_s6 = sadd.s32 1, %s929_s14  ;;  %p25_p7 = scmp.eq.s32.totalorder %s24_s5, 0 }
  0x10   : > { %693 = dma.hbm_to_vmem [thread:$0]  (!%p691_p6), %s131_s18, 512, %s133_s22, [#allocation6], %s937_s28, %s937_s28, %s938_s29  }
  0x11   : > { %696 = dma.hbm_to_vmem [thread:$0]  (!%p691_p6), %s145_s25, 512, %s147_s27, [#allocation6], %s937_s28, %s937_s28, %s938_s29  }
  0x12   : > { %p34_p8 = scmp.ne.s32.totalorder %s929_s14, %s925_s13  ;;  %p35_p9 = scmp.eq.s32.totalorder %s933_s15, 0 }
  0x13   : > { %p40_p10 = scmp.ne.s32.totalorder %s925_s13, %s921_s12  ;;  %p106_p13 = scmp.eq.s32.totalorder %s993_s19, 1 }
  0x14   : > { %s1023_s7 = scalar_select %p25_p7, %s929_s14, %s27_s6  }
  0x15   : > { %p1025_p11 = por %p35_p9, %p34_p8  ;;  %p1031_p12 = por %p41_p1, %p40_p10 }
  0x16   : > { %p112_p0 = scmp.eq.s32.totalorder %s648_s30, 1  ;;  %p707_p2 = scmp.lt.s32.totalorder %s933_s15, 2 }
  0x17   : > { %s160_s10 = sand.u32 1, %s929_s14   ;;  %p1038_p4 = por %p106_p13, %p34_p8 }
  0x18   : > { %p1042_p6 = por %p112_p0, %p40_p10  ;;  %s653_s17 = sshll.u32 %s160_s10, 3 }
  0x19   : > { %s654_s18 = sshll.u32 %s933_s15, 3  ;;  %s164_s24 = scalar_lea.vmem [#allocation2], %s653_s17 }
  0x1a   : > { %s168_s23 = scalar_lea.hbm %s1149_s0, %s654_s18  ;;  %s172_s25 = sshll.u32 %s164_s24, 4  ;;  %s173_s25 = int_to_ptr.vmem [resolvable:$true] %s172_s25 }
  0x1b   : > { %s170_s26 = sshll.u32 %s168_s23, 4  ;;  %p1052_p7 = pnand %p707_p2, %p1025_p11  ;;  %s171_s26 = int_to_ptr.hbm [resolvable:$true] %s170_s26 }
  0x1c   : > { %s161_s28 = scalar_lea.sflag [#allocation3], %s160_s10  ;;  %s833_s29 = sshra.s32 %s171_s26, 4  ;;  %s834_s29 = int_to_ptr.hbm [resolvable:$true] %s833_s29 }
  0x1d   : > { %s835_s30 = scalar_lea.hbm %s834_s29, 8  ;;  %p837_p9 = pneg %p1052_p7 }
  0x1e   : > { %p836_p8 = scmp.ne.s32.totalorder %s834_s29, %s835_s30  ;;  %s840_s17 = scalar_lea.hbm %s1149_s0, 16 }
  0x1f   : > { %p841_p11 = scmp.lt.s32.totalorder %s834_s29, %s1149_s0  ;;  %p842_p0 = scmp.lt.s32.totalorder %s840_s17, %s835_s30 }
  0x20   : > { %p838_p10 = pnand %p837_p9, %p836_p8 }
  0x21   : > { %p843_p2 = por %p842_p0, %p841_p11 }
  0x22   : > { %p839_p13 = pneg %p838_p10 }
  0x24   : > { %p844_p5 = pnand %p843_p2, %p839_p13 }
  0x26   : > { %847 = shalt.err (!%p844_p5)
}
  0x27   : > { %700 = dma.hbm_to_vmem [thread:$0]  (!%p1052_p7), %s171_s26, 128, %s173_s25, %s161_s28  }
  0x28   : > { %181 = sbr.rel (%p998_p3) target bundleno = 1076 (0x434), region = 32  ;;  %s1069_s10 = sand.u32 (!%p998_p3), 1, %s925_s13  }
  0x29   : > { %s656_s21 = sshll.u32 (!%p998_p3), %s1069_s10, 3  ;;  %s184_s22 = scalar_lea.sflag (!%p998_p3), [#allocation3], %s1069_s10 }
  0x2a   : > { %s187_s23 = scalar_lea.vmem (!%p998_p3), [#allocation2], %s656_s21 }
  0x2d   : > { %908 = dma.done.wait (%p1031_p12), %s184_s22, 128  }
  0x2e   : > { %910 = vsyncadd (%p1031_p12), %s184_s22, 4294967168 }
  0x2f   : > { %912 = dma.done.wait (%p41_p1), [#allocation6], 1024  }
  0x30   : > { %914 = vsyncadd (%p41_p1), [#allocation6], 4294966272  ;;  %v225_v0 = vld [vmem:[#allocation5 + $0x18] sm:$0xff]  ;;  %v224_v1 = vld [vmem:[#allocation5 + $0x10] sm:$0xff]  ;;  %vm226_vm0 = vcmask 261120   ;;  %s939_s20 = smov 88  }
  0x31   : > { %242 = vmatpush.msra.mxu0 %v225_v0  ;;  %v223_v2 = vld [vmem:[#allocation5 + $0x8] sm:$0xff]  ;;  %v222_v3 = vld [vmem:[#allocation5] sm:$0xff]  ;;  %v221_v4 = vld [vmem:[%s187_s23] sm:$0xff]  ;;  %s940_s9 = smov 96   ;;  %s941_s24 = smov 104   ;;  %vm254_vm1 = vcmask 64512  }
  0x32   : > { %s942_s25 = smov 112   ;;  %s943_s26 = smov 120   ;;  %v518_v58 = vld [vmem:[#allocation7 + $0x18] sm:$0xff]  ;;  %v517_v59 = vld [vmem:[#allocation7 + $0x10] sm:$0xff]  ;;  %v516_v60 = vld [vmem:[#allocation7 + $0x8] sm:$0xff]  ;;  %vm511_vm2 = vcmask 130048  }
  0x33   : > { %243 = vmatpush.msra.mxu0 %v224_v1  ;;  %s944_s27 = smov 80   ;;  %s945_s28 = smov 72   ;;  %v515_v61 = vld [vmem:[#allocation7] sm:$0xff]  ;;  %vm513_vm3 = vcmask 195584  }
  0x34   : > { %s946_s29 = smov 16   ;;  %s947_s30 = smov 8  }
  0x35   : > { %244 = vmatpush.msra.mxu0 %v223_v2  ;;  %s948_s5 = smov 24   ;;  %s675_s6 = sshll.u32 %s993_s19, 3 }
  0x36   : > { %s554_s8 = scalar_lea.hbm %s1152_s3, %s675_s6  ;;  %s220_s22 = scalar_lea.vmem [#allocation8], %s656_s21 }
  0x37   : > { %245 = vmatpush.msra.mxu0 %v222_v3  ;;  %s556_s23 = sshll.u32 %s220_s22, 4  ;;  %s557_s23 = int_to_ptr.vmem [resolvable:$true] %s556_s23 }
  0x38   : > { %660 = vmatmul.msk.f32.vlgmr.msra.gmra.mxu0 %vm226_vm0, %v221_v4 }
  0xb5   : > { %v1084_v5 = vpop.f32.mrf.mxu0 }
  0xb6   : > { %377 = vrot.lane.b32.xlu1 %v1084_v5, %s939_s20  ;;  %252 = vrot.lane.b32.xlu0 %v1084_v5, %s940_s9  ;;  %v250_v6 = vmul.f32 0.35355338, %v1084_v5  ;;  %s558_s20 = sshll.u32 %s554_s8, 4  ;;  %s544_s9 = scalar_lea.sflag [#allocation4], %s1069_s10  ;;  %s559_s20 = int_to_ptr.hbm [resolvable:$true] %s558_s20 }
  0xb8   : > { %440 = vrot.lane.b32.xlu2 %v250_v6, %s941_s24  ;;  %s877_s24 = sshra.s32 %s559_s20, 4  ;;  %s878_s24 = int_to_ptr.hbm [resolvable:$true] %s877_s24 }
  0xb9   : > { %p884_p12 = scmp.lt.s32.totalorder %s878_s24, %s1152_s3 }
  0xbe   : > { %375 = vrot.lane.b32.xlu1 %v250_v6, %s942_s25  ;;  %317 = vrot.lane.b32.xlu0 %v250_v6, %s943_s26  ;;  %s879_s25 = scalar_lea.hbm %s878_s24, 8 }
  0xbf   : > { %p880_p1 = scmp.ne.s32.totalorder %s878_s24, %s879_s25 }
  0xc1   : > { %p881_p3 = pnand %p880_p1, %p1038_p4 }
  0xc3   : > { %p882_p5 = pneg %p881_p3 }
 0x112   : > { %v441_v9 = vpop.permute.xlu2 %440 }
 0x128   : > { %v378_v7 = vpop.permute.xlu1 %377  ;;  %v253_v8 = vpop.permute.xlu0 %252 }
 0x129   : > { %661 = vmatpush.xpose.msk.msra.mxu1 %vm254_vm1, %v253_v8  ;;  %664 = vmatpush.xpose.msk.msra.mxu3 %vm254_vm1, %v253_v8 }
 0x12a   : > { %670 = vmatpush.xpose.msk.msrb.mxu0 %vm254_vm1, %v378_v7 }
 0x12c   : > { %662 = vmatmul.msk.f32.vlgmr.msra.gmra.mxu1 %vm254_vm1, %v250_v6 }
 0x12d   : > { %667 = vmatpush.xpose.msk.msrb.mxu1 %vm254_vm1, %v378_v7  ;;  %671 = vmatmul.msk.f32.vlgmr.msrb.gmra.mxu0 %vm254_vm1, %v441_v9 }
 0x130   : > { %v318_v10 = vpop.permute.xlu0 %317  ;;  %v376_v11 = vpop.permute.xlu1 %375 }
 0x131   : > { %665 = vmatmul.msk.f32.vlgmr.msra.gmra.mxu3 %vm254_vm1, %v318_v10  ;;  %534 = vmatpush.msra.mxu1 %v518_v58 }
 0x133   : > { %535 = vmatpush.msra.mxu1 %v517_v59 }
 0x134   : > { %668 = vmatmul.msk.f32.vlgmr.msrb.gmra.mxu1 %vm254_vm1, %v376_v11 }
 0x135   : > { %536 = vmatpush.msra.mxu1 %v516_v60 }
 0x137   : > { %537 = vmatpush.msra.mxu1 %v515_v61 }
 0x1a9   : > { %v277_v12 = vpop.f32.mrf.mxu1 }
 0x1aa   : > { %v280_v13 = vsel %vm254_vm1, %v277_v12, -inf  ;;  %v461_v14 = vpop.f32.mrf.mxu0 }
 0x1ab   : > { %281 = vmax.xlane.f32.xlu2 %v280_v13  ;;  %v464_v17 = vsel %vm254_vm1, %v461_v14, -inf }
 0x1b1   : > { %v400_v15 = vpop.f32.mrf.mxu1 }
 0x1b2   : > { %v403_v16 = vsel %vm254_vm1, %v400_v15, -inf }
 0x1b3   : > { %404 = vmax.xlane.f32.xlu1 %v403_v16  ;;  %465 = vmax.xlane.f32.xlu2 %v464_v17 }
 0x1b4   : > { %v338_v18 = vpop.f32.mrf.mxu3 }
 0x1b5   : > { %v341_v19 = vsel %vm254_vm1, %v338_v18, -inf }
 0x1b6   : > { %342 = vmax.xlane.f32.xlu0 %v341_v19 }
 0x1cc   : > { %291 = vrot.lane.b32.xlu1 %v1084_v5, %s944_s27  ;;  %s883_s27 = scalar_lea.hbm %s1152_s3, 16 }
 0x1cd   : > { %p885_p7 = scmp.lt.s32.totalorder %s883_s27, %s879_s25 }
 0x1cf   : > { %p886_p8 = por %p885_p7, %p884_p12 }
 0x1d1   : > { %p887_p9 = pnand %p886_p8, %p882_p5 }
 0x21e   : > { %v282_v20 = vpop.xlane.xlu2 %281 }
 0x21f   : > { %v283_v21 = vsub.f32 %v277_v12, %v282_v20 }
 0x221   : > { %v284_v22 = vmul.f32 1.442695, %v283_v21 }
 0x223   : > { %757 = vpow2.f32 %v284_v22 }
 0x226   : > { %v405_v23 = vpop.xlane.xlu1 %404  ;;  %v466_v27 = vpop.xlane.xlu2 %465 }
 0x227   : > { %v406_v24 = vsub.f32 %v400_v15, %v405_v23  ;;  %v467_v31 = vsub.f32 %v461_v14, %v466_v27 }
 0x229   : > { %v758_v25 = vpop.eup %757  ;;  %v407_v26 = vmul.f32 1.442695, %v406_v24  ;;  %v343_v28 = vpop.xlane.xlu0 %342  ;;  %v468_v33 = vmul.f32 1.442695, %v467_v31 }
 0x22a   : > { %v344_v29 = vsub.f32 %v338_v18, %v343_v28  ;;  %v286_v30 = vsel %vm254_vm1, %v758_v25, 0.0 }
 0x22b   : > { %759 = vpow2.f32 %v407_v26  ;;  %287 = vadd.xlane.f32.xlu2 %v286_v30 }
 0x22c   : > { %v345_v32 = vmul.f32 1.442695, %v344_v29 }
 0x22e   : > { %761 = vpow2.f32 %v345_v32 }
 0x22f   : > { %763 = vpow2.f32 %v468_v33 }
 0x231   : > { %v760_v34 = vpop.eup %759 }
 0x232   : > { %v409_v35 = vsel %vm254_vm1, %v760_v34, 0.0 }
 0x233   : > { %410 = vadd.xlane.f32.xlu2 %v409_v35 }
 0x234   : > { %v762_v36 = vpop.eup %761 }
 0x235   : > { %v347_v37 = vsel %vm254_vm1, %v762_v36, 0.0  ;;  %v764_v38 = vpop.eup %763 }
 0x236   : > { %348 = vadd.xlane.f32.xlu0 %v347_v37  ;;  %v470_v39 = vsel %vm254_vm1, %v764_v38, 0.0 }
 0x23e   : > { %v292_v40 = vpop.permute.xlu1 %291  ;;  %471 = vadd.xlane.f32.xlu0 %v470_v39 }
 0x23f   : > { %312 = vmatpush.msra.mxu2 %v292_v40 }
 0x241   : > { %370 = vmatpush.msrb.mxu2 %v292_v40 }
 0x24b   : > { %414 = vrot.lane.b32.xlu2 %v1084_v5, %s945_s28 }
 0x29e   : > { %v288_v41 = vpop.xlane.xlu2 %287 }
 0x29f   : > { %765 = vrcp.f32 %v288_v41 }
 0x2a5   : > { %v766_v42 = vpop.eup %765 }
 0x2a6   : > { %v411_v43 = vpop.xlane.xlu2 %410  ;;  %v290_v44 = vmul.f32 %v766_v42, %v758_v25 }
 0x2a7   : > { %767 = vrcp.f32 %v411_v43 }
 0x2a8   : > { %663 = vmatmul.msk.f32.vlgmr.msra.gmra.mxu2 %vm254_vm1, %v290_v44 }
 0x2a9   : > { %v349_v45 = vpop.xlane.xlu0 %348 }
 0x2aa   : > { %769 = vrcp.f32 %v349_v45 }
 0x2ad   : > { %v768_v46 = vpop.eup %767 }
 0x2ae   : > { %v415_v47 = vpop.permute.xlu2 %414  ;;  %v413_v48 = vmul.f32 %v768_v46, %v760_v34 }
 0x2af   : > { %435 = vmatpush.msrb.mxu3 %v415_v47  ;;  %493 = vmatpush.msra.mxu2 %v415_v47 }
 0x2b0   : > { %v770_v49 = vpop.eup %769  ;;  %669 = vmatmul.msk.f32.vlgmr.msrb.gmra.mxu3 %vm254_vm1, %v413_v48 }
 0x2b1   : > { %v472_v50 = vpop.xlane.xlu0 %471  ;;  %v351_v51 = vmul.f32 %v770_v49, %v762_v36 }
 0x2b2   : > { %771 = vrcp.f32 %v472_v50 }
 0x2b3   : > { %666 = vmatmul.msk.f32.vlgmr.msrb.gmra.mxu2 %vm254_vm1, %v351_v51 }
 0x2b8   : > { %v772_v52 = vpop.eup %771 }
 0x2b9   : > { %v474_v53 = vmul.f32 %v772_v52, %v764_v38 }
 0x2bb   : > { %672 = vmatmul.msk.f32.vlgmr.msra.gmra.mxu2 %vm254_vm1, %v474_v53 }
 0x32b   : > { %v314_v54 = vpop.f32.mrf.mxu2 }
 0x333   : > { %v437_v55 = vpop.f32.mrf.mxu3 }
 0x334   : > { %503 = vrot.lane.b32.xlu1 %v437_v55, %s946_s29 }
 0x336   : > { %v372_v56 = vpop.f32.mrf.mxu2 }
 0x337   : > { %499 = vrot.lane.b32.xlu0 %v372_v56, %s947_s30 }
 0x33e   : > { %v495_v57 = vpop.f32.mrf.mxu2 }
 0x33f   : > { %507 = vrot.lane.b32.xlu1 %v495_v57, %s948_s5 }
 0x3a6   : > { %v504_v62 = vpop.permute.xlu1 %503 }
 0x3a9   : > { %v500_v63 = vpop.permute.xlu0 %499 }
 0x3aa   : > { %v510_v0 = vsel %vm254_vm1, %v314_v54, %v500_v63 }
 0x3ab   : > { %v512_v1 = vsel %vm511_vm2, %v510_v0, %v504_v62 }
 0x3b1   : > { %v508_v2 = vpop.permute.xlu1 %507 }
 0x3b2   : > { %v514_v3 = vsel %vm513_vm3, %v512_v1, %v508_v2 }
 0x3b3   : > { %673 = vmatmul.msk.f32.vlgmr.msra.gmra.mxu1 %vm226_vm0, %v514_v3 }
 0x430   : > { %v539_v4 = vpop.f32.mrf.mxu1 }
 0x431   : > { %542 = vst.msk [vmem:[%s220_s22] sm:$0xff] %vm226_vm0, %v539_v4 }
 0x432   : > { %890 = shalt.err (!%p887_p9)
}
 0x433   : > { %688 = dma.vmem_to_hbm [thread:$0]  (%p1038_p4), %s557_s23, 128, %s559_s20, %s544_s9  }
 0x434 PF: > { %s570_s10 = sand.u32 1, %s921_s12   ;;  %p1159_p10 = scmp.ge.s32.totalorder %s933_s15, 2 }
 0x435   : > { %s571_s29 = scalar_lea.sflag [#allocation4], %s570_s10 }
 0x436   : > { %p702_p13 = pnand %p1159_p10, %p1042_p6 }
 0x438   : > { %p703_p11 = pneg %p702_p13 }
 0x43a   : > { %916 = dma.done.wait (%p703_p11), %s571_s29, 128  }
 0x43b   : > { %918 = vsyncadd (%p703_p11), %s571_s29, 4294967168  ;;  %p17_p0 = scmp.ge.s32.totalorder %s1012_s4, 4   ;;  %s1160_s12 = smov %s925_s13 }
 0x43c   : > { %s1161_s13 = smov %s929_s14  ;;  %s1162_s14 = smov %s1023_s7 }
 0x43d   : > { %s1163_s15 = smov %s1012_s4  ;;  %19 = sbr.rel (!%p17_p0) target bundleno = 6 (0x6), region = 85 }
 0x442   :  { %577 = vsyncpa [#allocation3], 1 }
 0x443   :  { %579 = vsyncpa [#allocation3 + $0x1], 1 }
 0x444   :  { %580 = vsyncpa [#allocation6], 1 }
 0x445   :  { %581 = vsyncpa [#allocation4], 1 }
 0x446   :  { %583 = vsyncpa [#allocation4 + $0x1], 1 }

</bundles_post_ra>
